<compile_context>
chip_gen: v5e
topology: v5e:2x2
jax: 0.10.0
libtpu: 0.0.40
codegen_flags: <defaults>
</compile_context>

<pallas_src>
import jax
import jax.numpy as jnp
from jax.experimental import pallas as pl
from jax.experimental.pallas import tpu as pltpu


# ---------------------------- Pallas kernel ----------------------------

def _channel_att_kernel(x_ref, p_ref, o_ref):
    # x_ref: (N, C, HW)    NCHW-native; HW on the lane axis (lane-dense reduces)
    # p_ref: (2*Cr+2, C)   rows [0,Cr)=w1^T, [Cr,2Cr)=w2, row 2Cr=b2,
    #                      row 2Cr+1=b1 zero-padded to C lanes
    # o_ref: (N, C)        sigmoid(fc(avg)) + sigmoid(fc(max))
    n, c, hw = x_ref.shape
    cr = (p_ref.shape[0] - 2) // 2

    x = x_ref[...]                                        # (N, C, HW)
    avg = jnp.sum(x, axis=-1) * (1.0 / hw)                # (N, C)  lane reduce (XLU)
    mx = jnp.max(x, axis=-1)                              # (N, C)  lane reduce (XLU)
    pooled = jnp.concatenate([avg, mx], axis=0)           # (2N, C) avg rows | max rows

    b2 = p_ref[2 * cr:2 * cr + 1, :]                      # (1, C)
    b1 = p_ref[2 * cr + 1:2 * cr + 2, :]                  # (1, C); first Cr lanes valid

    acc = jnp.broadcast_to(b2, (2 * n, c))                # (2N, C)
    for r in range(cr):                                   # Cr is tiny & static (2 here)
        w1t_r = p_ref[r:r + 1, :]                         # (1, C) = w1[:, r]^T
        w2_r = p_ref[cr + r:cr + r + 1, :]                # (1, C) = w2[r, :]
        # FC1 row r on VPU+XLU: h_r = relu(<pooled_row, w1[:, r]> + b1[r])
        h_r = jnp.sum(pooled * w1t_r, axis=-1, keepdims=True)      # (2N, 1)
        h_r = jnp.maximum(h_r + b1[:, r:r + 1], 0.0)
        # FC2 contribution on VPU: broadcast-FMA
        acc = acc + h_r * w2_r                            # (2N, C)

    gate = jax.nn.sigmoid(acc)                            # one EUP pass for avg & max
    o_ref[...] = gate[0:n, :] + gate[n:, :]               # avg_out + max_out -> (N, C)


# ---------------------------- wrapper ----------------------------

def channel_att(x_nchw, w1, b1, w2, b2):
    """ChannelAtt forward. x_nchw: (N, C, H, W) -> (N, C, 1, 1)."""
    N, C, H, W = x_nchw.shape
    Cr = w1.shape[1]
    HW = H * W

    # Free view: no data movement; channels stay where NCHW put them.
    x3 = x_nchw.reshape(N, C, HW)

    # Pack all FC parameters into one lane-major (2*Cr+2, C) array (tiny XLA op):
    # fewer kernel operands -> fewer tiny DMAs at kernel start.
    b1_row = jnp.pad(b1.reshape(1, Cr).astype(jnp.float32), ((0, 0), (0, C - Cr)))
    params = jnp.concatenate(
        [w1.T, w2, b2.reshape(1, C), b1_row], axis=0).astype(jnp.float32)

    out = pl.pallas_call(
        _channel_att_kernel,
        out_shape=jax.ShapeDtypeStruct((N, C), jnp.float32),
        grid=(1,),                        # single step: whole batch at once
        in_specs=[
            pl.BlockSpec((N, C, HW), lambda i: (0, 0, 0)),
            pl.BlockSpec((2 * Cr + 2, C), lambda i: (0, 0)),
        ],
        out_specs=pl.BlockSpec((N, C), lambda i: (0, 0)),
        compiler_params=pltpu.CompilerParams(
            dimension_semantics=("arbitrary",)),
    )(x3, params)
    return out.reshape(N, C, 1, 1)        # free metadata reshape


# ---------------------------- pure-JAX reference ----------------------------

def channel_att_ref(x_nchw, w1, b1, w2, b2):
    N, C, H, W = x_nchw.shape
    xf = x_nchw.reshape(N, C, H * W)
    avg = jnp.mean(xf, axis=-1)                  # (N, C)
    mx = jnp.max(xf, axis=-1)                    # (N, C)

    def fc(v):
        h = jnp.maximum(v @ w1 + b1, 0.0)
        return jax.nn.sigmoid(h @ w2 + b2)

    out = fc(avg) + fc(mx)
    return out.reshape(N, C, 1, 1)


# ---------------------------- main ----------------------------

if __name__ == "__main__":
    N, C, H, W = 2, 32, 16, 16          # inp = 32
    reduction = 16
    Cr = C // reduction                 # 2

    key = jax.random.PRNGKey(0)
    ks = jax.random.split(key, 5)

    def init(k, shape, scale=0.1):
        return scale * jax.random.normal(k, shape, jnp.float32)

    # fc = Conv1x1(C -> C/r) + ReLU + Conv1x1(C/r -> C) + Sigmoid
    # (PyTorch Conv2d weight (out, in, 1, 1) is stored transposed as (in, out).)
    w1 = init(ks[0], (C, Cr))
    b1 = init(ks[1], (1, Cr))
    w2 = init(ks[2], (Cr, C))
    b2 = init(ks[3], (1, C))
    x = jax.random.normal(ks[4], (N, C, H, W), jnp.float32)

    out = jax.jit(channel_att)(x, w1, b1, w2, b2)
    jax.block_until_ready(out)

    ref = channel_att_ref(x, w1, b1, w2, b2)
    assert out.shape == (N, C, 1, 1)
    assert bool(jnp.all(jnp.isfinite(out)))
    assert bool(jnp.allclose(out, ref, rtol=1e-3, atol=1e-3))
    print("KERNEL_OK")
</pallas_src>

<mosaic_0001>
module attributes {stable_mosaic.version = 11 : i64} {
  func.func @_channel_att_kernel(%arg0: i32, %arg1: memref<2x32x256xf32, #tpu.memory_space<vmem>>, %arg2: memref<6x32xf32, #tpu.memory_space<vmem>>, %arg3: memref<2x32xf32, #tpu.memory_space<vmem>>) attributes {dimension_semantics = [#tpu.dimension_semantics<arbitrary>], iteration_bounds = array<i64: 1>, scalar_prefetch = 0 : i64, scratch_operands = 0 : i64, tpu.core_type = #tpu.core_type<tc>, window_params = [{pipeline_mode = #tpu.pipeline_mode<synchronous>, transform_indices = @transform_0, window_bounds = array<i64: 2, 32, 256>}, {pipeline_mode = #tpu.pipeline_mode<synchronous>, transform_indices = @transform_1, window_bounds = array<i64: 6, 32>}, {pipeline_mode = #tpu.pipeline_mode<synchronous>, transform_indices = @transform_2, window_bounds = array<i64: 2, 32>}]} {
    %c0 = arith.constant 0 : index
    %c0_0 = arith.constant 0 : index
    %c0_1 = arith.constant 0 : index
    %0 = vector.load %arg1[%c0, %c0_0, %c0_1] : memref<2x32x256xf32, #tpu.memory_space<vmem>>, vector<2x32x256xf32>
    %cst = arith.constant dense<0.000000e+00> : vector<2x32xf32>
    %1 = vector.multi_reduction <add>, %0, %cst [2] : vector<2x32x256xf32> to vector<2x32xf32>
    %cst_2 = arith.constant 3.906250e-03 : f32
    %2 = vector.broadcast %cst_2 : f32 to vector<2x32xf32>
    %3 = arith.mulf %1, %2 : vector<2x32xf32>
    %cst_3 = arith.constant dense<0xFF800000> : vector<2x32xf32>
    %4 = vector.multi_reduction <maximumf>, %0, %cst_3 [2] : vector<2x32x256xf32> to vector<2x32xf32>
    %5 = tpu.concatenate %3, %4 in 0 : vector<2x32xf32>, vector<2x32xf32> -> vector<4x32xf32>
    %c4 = arith.constant 4 : index
    %c0_4 = arith.constant 0 : index
    %6 = vector.load %arg2[%c4, %c0_4] : memref<6x32xf32, #tpu.memory_space<vmem>>, vector<1x32xf32>
    %c5 = arith.constant 5 : index
    %c0_5 = arith.constant 0 : index
    %7 = vector.load %arg2[%c5, %c0_5] : memref<6x32xf32, #tpu.memory_space<vmem>>, vector<1x32xf32>
    %8 = vector.shape_cast %6 : vector<1x32xf32> to vector<1x32xf32>
    %9 = vector.broadcast %8 : vector<1x32xf32> to vector<4x32xf32>
    %c0_6 = arith.constant 0 : index
    %c0_7 = arith.constant 0 : index
    %10 = vector.load %arg2[%c0_6, %c0_7] : memref<6x32xf32, #tpu.memory_space<vmem>>, vector<1x32xf32>
    %c2 = arith.constant 2 : index
    %c0_8 = arith.constant 0 : index
    %11 = vector.load %arg2[%c2, %c0_8] : memref<6x32xf32, #tpu.memory_space<vmem>>, vector<1x32xf32>
    %12 = vector.broadcast %10 : vector<1x32xf32> to vector<4x32xf32>
    %13 = arith.mulf %5, %12 : vector<4x32xf32>
    %cst_9 = arith.constant dense<0.000000e+00> : vector<4xf32>
    %14 = vector.multi_reduction <add>, %13, %cst_9 [1] : vector<4x32xf32> to vector<4xf32>
    %15 = vector.shape_cast %14 : vector<4xf32> to vector<4x1xf32>
    %16 = vector.extract_strided_slice %7 {offsets = [0, 0], sizes = [1, 1], strides = [1, 1]} : vector<1x32xf32> to vector<1x1xf32>
    %17 = vector.broadcast %16 : vector<1x1xf32> to vector<4x1xf32>
    %18 = arith.addf %15, %17 : vector<4x1xf32>
    %cst_10 = arith.constant 0.000000e+00 : f32
    %19 = vector.broadcast %cst_10 : f32 to vector<4x1xf32>
    %20 = arith.maximumf %18, %19 : vector<4x1xf32>
    %21 = vector.broadcast %20 : vector<4x1xf32> to vector<4x32xf32>
    %22 = vector.broadcast %11 : vector<1x32xf32> to vector<4x32xf32>
    %23 = arith.mulf %21, %22 : vector<4x32xf32>
    %24 = arith.addf %9, %23 : vector<4x32xf32>
    %c1 = arith.constant 1 : index
    %c0_11 = arith.constant 0 : index
    %25 = vector.load %arg2[%c1, %c0_11] : memref<6x32xf32, #tpu.memory_space<vmem>>, vector<1x32xf32>
    %c3 = arith.constant 3 : index
    %c0_12 = arith.constant 0 : index
    %26 = vector.load %arg2[%c3, %c0_12] : memref<6x32xf32, #tpu.memory_space<vmem>>, vector<1x32xf32>
    %27 = vector.broadcast %25 : vector<1x32xf32> to vector<4x32xf32>
    %28 = arith.mulf %5, %27 : vector<4x32xf32>
    %cst_13 = arith.constant dense<0.000000e+00> : vector<4xf32>
    %29 = vector.multi_reduction <add>, %28, %cst_13 [1] : vector<4x32xf32> to vector<4xf32>
    %30 = vector.shape_cast %29 : vector<4xf32> to vector<4x1xf32>
    %31 = vector.extract_strided_slice %7 {offsets = [0, 1], sizes = [1, 1], strides = [1, 1]} : vector<1x32xf32> to vector<1x1xf32>
    %32 = vector.broadcast %31 : vector<1x1xf32> to vector<4x1xf32>
    %33 = arith.addf %30, %32 : vector<4x1xf32>
    %cst_14 = arith.constant 0.000000e+00 : f32
    %34 = vector.broadcast %cst_14 : f32 to vector<4x1xf32>
    %35 = arith.maximumf %33, %34 : vector<4x1xf32>
    %36 = vector.broadcast %35 : vector<4x1xf32> to vector<4x32xf32>
    %37 = vector.broadcast %26 : vector<1x32xf32> to vector<4x32xf32>
    %38 = arith.mulf %36, %37 : vector<4x32xf32>
    %39 = arith.addf %24, %38 : vector<4x32xf32>
    %40 = arith.negf %39 : vector<4x32xf32>
    %41 = math.exp %40 : vector<4x32xf32>
    %cst_15 = arith.constant 1.000000e+00 : f32
    %42 = vector.broadcast %cst_15 : f32 to vector<4x32xf32>
    %43 = arith.addf %42, %41 : vector<4x32xf32>
    %44 = arith.divf %42, %43 : vector<4x32xf32>
    %45 = vector.extract_strided_slice %44 {offsets = [0, 0], sizes = [2, 32], strides = [1, 1]} : vector<4x32xf32> to vector<2x32xf32>
    %46 = vector.extract_strided_slice %44 {offsets = [2, 0], sizes = [2, 32], strides = [1, 1]} : vector<4x32xf32> to vector<2x32xf32>
    %47 = arith.addf %45, %46 : vector<2x32xf32>
    %c0_16 = arith.constant 0 : index
    %c0_17 = arith.constant 0 : index
    %48 = vector.load %arg3[%c0_16, %c0_17] : memref<2x32xf32, #tpu.memory_space<vmem>>, vector<2x32xf32>
    tpu.vector_store %arg3[%c0_16, %c0_17], %47 {strides = array<i32>} : memref<2x32xf32, #tpu.memory_space<vmem>>, vector<2x32xf32>,
    return
  }
  func.func @transform_0(%arg0: i32) -> (i32, i32, i32) {
    %c0_i32 = arith.constant 0 : i32
    %c0_i32_0 = arith.constant 0 : i32
    %c0_i32_1 = arith.constant 0 : i32
    %c0_i32_2 = arith.constant 0 : i32
    return %c0_i32, %c0_i32_0, %c0_i32_1 : i32, i32, i32
  }
  func.func @transform_1(%arg0: i32) -> (i32, i32) {
    %c0_i32 = arith.constant 0 : i32
    %c0_i32_0 = arith.constant 0 : i32
    %c0_i32_1 = arith.constant 0 : i32
    return %c0_i32, %c0_i32_0 : i32, i32
  }
  func.func @transform_2(%arg0: i32) -> (i32, i32) {
    %c0_i32 = arith.constant 0 : i32
    %c0_i32_0 = arith.constant 0 : i32
    %c0_i32_1 = arith.constant 0 : i32
    return %c0_i32, %c0_i32_0 : i32, i32
  }
}

</mosaic_0001>

<bundles_post_ra>
// kernel: channel_att.1
= control target key start
LH: loop header
LB: loop body
LE: loop exit
PB: predicated region body
PF: predicated region fallthrough
CT: control target
= control target key end

     0   :  { %s366_s0 = inlined_call_operand.vmem [shape: f32[2,32,256], index: 0, kind: input, shape index: {}]   ;;  %s367_s1 = inlined_call_operand.vmem [shape: f32[6,32], index: 1, kind: input, shape index: {}]   ;;  %s368_s2 = inlined_call_operand.hbm [shape: f32[2,32], index: 2, kind: output, shape index: {}]  }
   0x1   :  { %v20_v0 = vld [vmem:[%s366_s0 + $0x40] sm:$0xff]  ;;  %v21_v1 = vld [vmem:[%s366_s0 + $0x48] sm:$0xff]  ;;  %v22_v9 = vld [vmem:[%s366_s0 + $0x50] sm:$0xff] }
   0x2   :  { %v12_v2 = vld [vmem:[%s366_s0] sm:$0xff]  ;;  %v40_v3 = vadd.f32 %v21_v1, %v20_v0  ;;  %v13_v4 = vld [vmem:[%s366_s0 + $0x8] sm:$0xff]  ;;  %v23_v10 = vld [vmem:[%s366_s0 + $0x58] sm:$0xff] }
   0x3   :  { %v16_v5 = vld [vmem:[%s366_s0 + $0x20] sm:$0xff]  ;;  %v17_v6 = vld [vmem:[%s366_s0 + $0x28] sm:$0xff]  ;;  %v28_v7 = vadd.f32 %v13_v4, %v12_v2  ;;  %v14_v11 = vld [vmem:[%s366_s0 + $0x10] sm:$0xff]  ;;  %v43_v15 = vadd.f32 %v23_v10, %v22_v9 }
   0x4   :  { %v34_v8 = vadd.f32 %v17_v6, %v16_v5  ;;  %41 = vadd.xlane.f32.xlu1 %v40_v3  ;;  %v15_v12 = vld [vmem:[%s366_s0 + $0x18] sm:$0xff]  ;;  %v24_v13 = vld [vmem:[%s366_s0 + $0x60] sm:$0xff]  ;;  %v25_v14 = vld [vmem:[%s366_s0 + $0x68] sm:$0xff] }
   0x5   :  { %29 = vadd.xlane.f32.xlu0 %v28_v7 }
   0x6   :  { %35 = vadd.xlane.f32.xlu2 %v34_v8 }
   0x7   :  { %7 = vsyncpa [#allocation3], 0  ;;  %v31_v16 = vadd.f32 %v15_v12, %v14_v11  ;;  %v46_v17 = vadd.f32 %v25_v14, %v24_v13  ;;  %v26_v18 = vld [vmem:[%s366_s0 + $0x70] sm:$0xff]  ;;  %v27_v19 = vld [vmem:[%s366_s0 + $0x78] sm:$0xff]  ;;  %v60_v24 = vmax.f32 %v12_v2, %v13_v4  ;;  %v72_v25 = vmax.f32 %v20_v0, %v21_v1  ;;  %s215_s27 = sshll.u32 %s368_s2, 4  ;;  %s216_s27 = int_to_ptr.hbm [resolvable:$true] %s215_s27 }
   0x8   :  { %v18_v20 = vld [vmem:[%s366_s0 + $0x30] sm:$0xff]  ;;  %v19_v21 = vld [vmem:[%s366_s0 + $0x38] sm:$0xff]  ;;  %v49_v22 = vadd.f32 %v27_v19, %v26_v18  ;;  %v63_v26 = vmax.f32 %v14_v11, %v15_v12  ;;  %v75_v27 = vmax.f32 %v22_v9, %v23_v10  ;;  %v78_v28 = vmax.f32 %v24_v13, %v25_v14 }
   0x9   :  { %v37_v23 = vadd.f32 %v19_v21, %v18_v20  ;;  %v66_v29 = vmax.f32 %v16_v5, %v17_v6  ;;  %v69_v30 = vmax.f32 %v18_v20, %v19_v21  ;;  %v81_v31 = vmax.f32 %v26_v18, %v27_v19 }
   0xa   :  { %v92_v41 = vlaneseq  ;;  %vm97_vm0 = vcmask 130112   ;;  %vm101_vm1 = vcmask 195712   ;;  %vm105_vm2 = vcmask 261312  }
   0xb   :  { %vm114_vm3 = vcmask 1041409   ;;  %vm139_vm4 = vcmask 1043459   ;;  %vm142_vm5 = vcmask 1041408   ;;  %vm151_vm6 = vcmask 257024  }
   0xc   :  { %44 = vadd.xlane.f32.xlu1 %v43_v15  ;;  %v93_v45 = vand.u32 127, %v92_v41  ;;  %vm206_vm11 = vcmask 254976  }
   0xd   :  { %32 = vadd.xlane.f32.xlu0 %v31_v16 }
   0xe   :  { %47 = vadd.xlane.f32.xlu2 %v46_v17  ;;  %v95_v47 = vadd.s32 4294967288, %v93_v45  ;;  %v99_v51 = vadd.s32 4294967280, %v93_v45  ;;  %v103_v55 = vadd.s32 4294967272, %v93_v45 }
  0x14   :  { %50 = vadd.xlane.f32.xlu1 %v49_v22 }
  0x15   :  { %38 = vadd.xlane.f32.xlu0 %v37_v23  ;;  %v231_v23 = vld [vmem:[%s367_s1 + $0x1] ss:$0 sm:$0xff] }
  0x16   :  { %61 = vmax.xlane.f32.xlu2 %v60_v24  ;;  %v232_v24 = vld [vmem:[%s367_s1] ss:$0 sm:$0xff] }
  0x1c   :  { %73 = vmax.xlane.f32.xlu1 %v72_v25 }
  0x1d   :  { %64 = vmax.xlane.f32.xlu0 %v63_v26 }
  0x1e   :  { %76 = vmax.xlane.f32.xlu2 %v75_v27 }
  0x24   :  { %79 = vmax.xlane.f32.xlu1 %v78_v28 }
  0x25   :  { %67 = vmax.xlane.f32.xlu0 %v66_v29 }
  0x26   :  { %70 = vmax.xlane.f32.xlu2 %v69_v30 }
  0x2d   :  { %82 = vmax.xlane.f32.xlu0 %v81_v31 }
  0x77   :  { %v42_v32 = vpop.xlane.xlu1 %41 }
  0x78   :  { %v30_v33 = vpop.xlane.xlu0 %29  ;;  %v56_v46 = vmul.f32 0.00390625, %v42_v32 }
  0x79   :  { %v36_v34 = vpop.xlane.xlu2 %35  ;;  %v52_v50 = vmul.f32 0.00390625, %v30_v33 }
  0x7a   :  { %v107_v52 = vperm.slane %v56_v46, %v93_v45  ;;  %v54_v53 = vmul.f32 0.00390625, %v36_v34  ;;  %v267_v34 = vmov 1  }
  0x7b   :  { %v94_v61 = vperm.slane %v52_v50, %v93_v45  ;;  %229 = vset.pattern.permute.xlu1 %v267_v34 }
  0x7c   :  { %v100_v3 = vperm.slane %v54_v53, %v99_v51 }
  0x7f   :  { %v45_v35 = vpop.xlane.xlu1 %44 }
  0x80   :  { %v33_v36 = vpop.xlane.xlu0 %32  ;;  %v57_v48 = vmul.f32 0.00390625, %v45_v35  ;;  %v268_v35 = vmov 0  }
  0x81   :  { %v48_v37 = vpop.xlane.xlu2 %47  ;;  %v53_v49 = vmul.f32 0.00390625, %v33_v36  ;;  %228 = vset.pattern.permute.xlu0 %v268_v35  ;;  %v233_v36 = vld [vmem:[%s367_s1 + $0x5] ss:$0 sm:$0xff] }
  0x82   :  { %v58_v54 = vmul.f32 0.00390625, %v48_v37  ;;  %v108_v57 = vperm.slane %v57_v48, %v95_v47 }
  0x83   :  { %v96_v58 = vperm.slane %v53_v49, %v95_v47 }
  0x84   :  { %v110_v4 = vperm.slane %v58_v54, %v99_v51  ;;  %v109_v7 = vsel %vm97_vm0, %v108_v57, %v107_v52 }
  0x85   :  { %v98_v8 = vsel %vm97_vm0, %v96_v58, %v94_v61 }
  0x86   :  { %v111_v15 = vsel %vm101_vm1, %v110_v4, %v109_v7  ;;  %v102_v16 = vsel %vm101_vm1, %v100_v3, %v98_v8 }
  0x87   :  { %v51_v38 = vpop.xlane.xlu1 %50 }
  0x88   :  { %v39_v39 = vpop.xlane.xlu0 %38  ;;  %v59_v59 = vmul.f32 0.00390625, %v51_v38 }
  0x89   :  { %v62_v40 = vpop.xlane.xlu2 %61  ;;  %v55_v60 = vmul.f32 0.00390625, %v39_v39 }
  0x8a   :  { %v125_v62 = vperm.slane %v62_v40, %v93_v45  ;;  %v112_v9 = vperm.slane %v59_v59, %v103_v55 }
  0x8b   :  { %v104_v10 = vperm.slane %v55_v60, %v103_v55 }
  0x8c   :  { %v113_v19 = vsel %vm105_vm2, %v112_v9, %v111_v15 }
  0x8d   :  { %v106_v20 = vsel %vm105_vm2, %v104_v10, %v102_v16 }
  0x8e   :  { %v115_v27 = vsel %vm114_vm3, %v113_v19, %v106_v20 }
  0x8f   :  { %v74_v43 = vpop.xlane.xlu1 %73 }
  0x90   :  { %v65_v42 = vpop.xlane.xlu0 %64  ;;  %v132_v63 = vperm.slane %v74_v43, %v93_v45  ;;  %v235_v43 = vld [vmem:[%s367_s1 + $0x2] ss:$0 sm:$0xff]  ;;  %v236_v45 = vld [vmem:[%s367_s1 + $0x3] ss:$0 sm:$0xff] }
  0x91   :  { %v77_v44 = vpop.xlane.xlu2 %76  ;;  %v126_v0 = vperm.slane %v65_v42, %v95_v47 }
  0x92   :  { %v133_v1 = vperm.slane %v77_v44, %v95_v47  ;;  %v234_v44 = vld [vmem:[%s367_s1 + $0x4] ss:$0 sm:$0xff]  ;;  %s269_s1 = smov [#allocation2]  }
  0x93   :  { %v127_v12 = vsel %vm97_vm0, %v126_v0, %v125_v62  ;;  %s213_s24 = sshll.u32 %s269_s1, 4  ;;  %s214_s24 = int_to_ptr.vmem [resolvable:$true] %s213_s24 }
  0x94   :  { %v134_v13 = vsel %vm97_vm0, %v133_v1, %v132_v63 }
  0x97   :  { %v80_v2 = vpop.xlane.xlu1 %79 }
  0x98   :  { %v68_v56 = vpop.xlane.xlu0 %67  ;;  %v135_v11 = vperm.slane %v80_v2, %v99_v51 }
  0x99   :  { %v128_v5 = vperm.slane %v68_v56, %v99_v51  ;;  %v71_v6 = vpop.xlane.xlu2 %70 }
  0x9a   :  { %v130_v14 = vperm.slane %v71_v6, %v103_v55  ;;  %v136_v22 = vsel %vm101_vm1, %v135_v11, %v134_v13 }
  0x9b   :  { %v129_v17 = vsel %vm101_vm1, %v128_v5, %v127_v12 }
  0x9c   :  { %v131_v25 = vsel %vm105_vm2, %v130_v14, %v129_v17 }
  0xa0   :  { %v83_v18 = vpop.xlane.xlu0 %82 }
  0xa1   :  { %v137_v21 = vperm.slane %v83_v18, %v103_v55 }
  0xa3   :  { %v138_v26 = vsel %vm105_vm2, %v137_v21, %v136_v22 }
  0xa4   :  { %v140_v28 = vsel %vm139_vm4, %v138_v26, %v131_v25 }
  0xa5   :  { %v143_v29 = vsel %vm142_vm5, %v115_v27, %v140_v28 }
  0xa6   :  { %v169_v30 = vmul.f32 %v231_v23, %v143_v29  ;;  %v150_v31 = vmul.f32 %v232_v24, %v143_v29 }
  0xa8   :  { %v170_v32 = vsel %vm151_vm6, %v169_v30, 0.0  ;;  %v152_v33 = vsel %vm151_vm6, %v150_v31, 0.0 }
  0xa9   :  { %171 = vadd.xlane.f32.xlu2 %v170_v32  ;;  %153 = vadd.xlane.f32.xlu1 %v152_v33 }
 0x11c   :  { %v172_v37 = vpop.xlane.xlu2 %171  ;;  %v154_v38 = vpop.xlane.xlu1 %153 }
 0x11d   :  { %v173_v39 = vadd.f32 %v233_v36, %v172_v37  ;;  %v156_v40 = vadd.f32 %v233_v36, %v154_v38 }
 0x11f   :  { %v174_v41 = vmax.f32 %v173_v39, 0.0  ;;  %v157_v42 = vmax.f32 %v156_v40, 0.0 }
 0x121   :  { %177 = vperm.xlu1 %229, %v174_v41   ;;  %160 = vperm.xlu0 %228, %v157_v42  }
 0x129   :  { %230 = vset.pattern.permute.xlu0 %v267_v34 }
 0x193   :  { %v161_v46 = vpop.permute.xlu0 %160  ;;  %v178_v47 = vpop.permute.xlu1 %177 }
 0x194   :  { %v164_v48 = vmul.f32 %v235_v43, %v161_v46  ;;  %v181_v50 = vmul.f32 %v236_v45, %v178_v47 }
 0x196   :  { %v165_v49 = vadd.f32 %v234_v44, %v164_v48 }
 0x198   :  { %v182_v51 = vadd.f32 %v181_v50, %v165_v49 }
 0x19a   :  { %v224_v52 = vmul.f32 -1.442695, %v182_v51 }
 0x19c   :  { %237 = vpow2.f32 %v224_v52 }
 0x1a2   :  { %v238_v53 = vpop.eup %237 }
 0x1a3   :  { %v186_v54 = vadd.f32 1.0, %v238_v53 }
 0x1a5   :  { %239 = vrcp.f32 %v186_v54  ;;  %v198_v58 = vand.u32 2147483648, %v186_v54  ;;  %v196_v60 = vand.u32 2147483647, %v186_v54  ;;  %vm192_vm8 = vweird.f32 %v186_v54 }
 0x1a7   :  { %v199_v62 = vor.u32 1.1754944e-38, %v198_v58  ;;  %vm197_vm10 = vcmp.eq.f32.partialorder %v196_v60, 8.507059e+37 }
 0x1ab   :  { %v240_v55 = vpop.eup %239 }
 0x1ac   :  { %v188_v56 = vmul.f32 %v240_v55, %v186_v54  ;;  %vm193_vm7 = vweird.f32 %v240_v55 }
 0x1ad   :  { %vm194_vm9 = vmor %vm192_vm8, %vm193_vm7 }
 0x1ae   :  { %v189_v57 = vsub.f32 1.0, %v188_v56 }
 0x1b0   :  { %v190_v59 = vmul.f32 %v240_v55, %v189_v57 }
 0x1b2   :  { %v191_v61 = vadd.f32 %v240_v55, %v190_v59 }
 0x1b4   :  { %v195_v63 = vsel %vm194_vm9, %v240_v55, %v191_v61 }
 0x1b5   :  { %v200_v0 = vsel %vm197_vm10, %v199_v62, %v195_v63 }
 0x1b6   :  { %v203_v1 = vrot.slane %v200_v0, 2 }
 0x1b8   :  { %v205_v2 = vadd.f32 %v203_v1, %v200_v0 }
 0x1ba   :  { %207 = vst.msk [vmem:[#allocation2] sm:$0x3] %vm206_vm11, %v205_v2 }
 0x1bb   :  { %218 = dma.vmem_to_hbm [thread:$0]  %s214_s24, 32, %s216_s27, [#allocation3]  }
 0x1bc   :  { %265 = dma.done.wait [#allocation3], 32  }
 0x1bd   :  { %266 = vsyncadd [#allocation3], 4294967264 }
 0x1be   :  { %223 = vsyncpa [#allocation3], 1 }

</bundles_post_ra>
